<compile_context>
chip_gen: v5e
topology: v5e:2x2
jax: 0.10.0
libtpu: 0.0.40
codegen_flags: <defaults>
</compile_context>

<pallas_src>
import functools

import numpy as np

import jax
import jax.numpy as jnp
from jax.experimental import pallas as pl
from jax.experimental.pallas import tpu as pltpu

EPS = 1e-5      # nn.BatchNorm2d default eps
LANE = 128      # TPU lane width


def _round_up(x, m):
    return (x + m - 1) // m * m


# ----------------------------- Pallas kernels ------------------------------ #

def _conv_all_parities(q_refs, w_ref):
    """One row-tile of the 3x3 conv (no bias).  q_refs are the four parity
    quadrants, each a (1, M, 4*Cin) bf16 block whose channel axis already holds
    the (dh, dw) halo taps.  w_ref is (4, 4*Cin, 4*cpad).  Returns an
    (M, 4*cpad) f32 array: the conv for the four output-pixel parities laid out
    as four cpad-wide lane chunks."""
    y = None
    for q in range(4):
        lhs = q_refs[q][0]                                   # (M, 4*Cin), bf16
        d = jnp.dot(lhs, w_ref[q], preferred_element_type=jnp.float32)
        y = d if y is None else y + d
    return y


def _stats_kernel(ee, eo, oe, oo, w_ref, stats_ref, *, cpad):
    """Pass 1: conv (no bias) -> per-channel sum / sumsq accumulated into a
    resident (1, 8, cpad) block (row 0 = sum, row 1 = sumsq) across the inner
    'arbitrary' grid axis.  The leading grid axis is 'parallel' (one partial
    result per core chunk)."""
    @pl.when(pl.program_id(1) == 0)
    def _init():
        stats_ref[...] = jnp.zeros_like(stats_ref)

    y = _conv_all_parities((ee, eo, oe, oo), w_ref)          # (M, 4*cpad) f32
    s = jnp.sum(y, axis=0, keepdims=True)                    # (1, 4*cpad)
    ss = jnp.sum(y * y, axis=0, keepdims=True)
    # fold the four parity chunks into one per-channel row (lane-aligned slices)
    s_c = s[:, :cpad] + s[:, cpad:2 * cpad] + s[:, 2 * cpad:3 * cpad] + s[:, 3 * cpad:]
    ss_c = ss[:, :cpad] + ss[:, cpad:2 * cpad] + ss[:, 2 * cpad:3 * cpad] + ss[:, 3 * cpad:]

    row = jax.lax.broadcasted_iota(jnp.int32, (8, cpad), 0)
    upd = jnp.where(row == 0, s_c, 0.0) + jnp.where(row == 1, ss_c, 0.0)
    stats_ref[0] = stats_ref[0] + upd


def _norm_pool_kernel(ee, eo, oe, oo, w_ref, scale_ref, shift_ref, out_ref, *, cpad):
    """Pass 2: conv recompute -> BN affine (conv bias folded into shift) ->
    ReLU -> 2x2 max-pool (max over the four parity chunks) -> one lane-dense
    bf16 store."""
    y = _conv_all_parities((ee, eo, oe, oo), w_ref)          # (M, 4*cpad) f32
    y = jnp.maximum(y * scale_ref[...] + shift_ref[...], 0.0)
    pooled = jnp.maximum(jnp.maximum(y[:, :cpad], y[:, cpad:2 * cpad]),
                         jnp.maximum(y[:, 2 * cpad:3 * cpad], y[:, 3 * cpad:]))
    out_ref[0] = pooled.astype(out_ref.dtype)


# ------------------------------- wrapper ----------------------------------- #

def _pick_block_h(H, W, cin, cpad, out_bytes, budget):
    """Largest even divisor of H whose estimated per-step VMEM footprint fits."""
    wo = W // 2
    k_lanes = _round_up(4 * cin, LANE)        # VMEM lane padding of lhs blocks
    for bh in range(H, 2, -1):
        if bh % 2 or H % bh:
            continue
        m = (bh // 2) * wo
        per_step = (4 * m * k_lanes * 2 * 2            # 4 lhs blocks, bf16, 2 buffers
                    + 4 * 4 * cin * 4 * cpad * 2 * 2   # weight block
                    + m * cpad * out_bytes * 2         # output block
                    + m * 4 * cpad * 4                 # f32 conv result
                    + m * cpad * 4                     # pooled f32
                    + 2 * 4 * cpad * 4 * 2)            # scale / shift
        if per_step <= budget:
            return bh
    return 2


def encoder_block(x_nchw, w_oihw, bias, gamma, beta, *, block_h=None,
                  matmul_dtype=jnp.bfloat16, out_dtype=jnp.bfloat16):
    N, Cin, H, W = x_nchw.shape
    Cout = w_oihw.shape[0]
    assert H % 2 == 0 and W % 2 == 0, "MaxPool2d(2) expects even H, W"
    Ho, Wo = H // 2, W // 2
    cpad = _round_up(Cout, LANE)                 # lane-dense channel layout

    # --- generation-aware VMEM budget (v7x: 64 MiB, v5e/v6e: 128 MiB) ---
    try:
        vmem_cap = int(pltpu.get_tpu_info().vmem_capacity_bytes)
    except Exception:
        vmem_cap = 64 * 1024 * 1024
    vmem_limit = int(min(vmem_cap * 3 // 4, 100 * 1024 * 1024))

    out_bytes = jnp.dtype(out_dtype).itemsize
    if block_h is None or block_h % 2 or H % block_h:
        block_h = _pick_block_h(H, W, Cin, cpad, out_bytes, vmem_limit // 2)
    th2 = block_h // 2                           # pooled rows per grid step
    n_t = Ho // th2                              # row tiles per image
    G = N * n_t                                  # grid size
    M = th2 * Wo                                 # lhs rows per grid step

    # --- layout glue: cast to bf16 FIRST, then transpose / pad / quadrants ---
    xb = x_nchw.astype(matmul_dtype)
    x_nhwc = jnp.transpose(xb, (0, 2, 3, 1))                     # (N, H, W, Cin)
    xp = jnp.pad(x_nhwc, ((0, 0), (1, 1), (1, 1), (0, 0)))       # (N, H+2, W+2, Cin)

    def quadrant(qh, qw):
        # parity quadrant of the padded input, with the (dh, dw) halo taps
        # folded into the channel axis; per-tile view is a pure reshape.
        q = xp[:, qh::2, qw::2, :]                               # (N, Ho+1, Wo+1, Cin)
        parts = [q[:, dh:dh + Ho, dw:dw + Wo, :]
                 for dh in range(2) for dw in range(2)]
        x4 = jnp.concatenate(parts, axis=-1)                     # (N, Ho, Wo, 4*Cin)
        return x4.reshape(G, M, 4 * Cin)

    quads = [quadrant(0, 0), quadrant(0, 1), quadrant(1, 0), quadrant(1, 1)]

    # --- weights: (O,I,KH,KW) -> per-quadrant (4*Cin, 4*cpad), slot/parity packed
    sel = np.zeros((4, 4, 4, 9), np.float32)     # [quadrant, slot, parity, tap]
    for ph in range(2):
        for pw in range(2):
            p = ph * 2 + pw
            for kh in range(3):
                for kw in range(3):
                    qh, dh = (ph + kh) % 2, (ph + kh) // 2
                    qw, dw = (pw + kw) % 2, (pw + kw) // 2
                    sel[qh * 2 + qw, dh * 2 + dw, p, kh * 3 + kw] = 1.0
    w_taps = jnp.transpose(w_oihw, (2, 3, 1, 0)).reshape(9, Cin, Cout)
    w_big = jnp.einsum('qspk,kio->qsipo', jnp.asarray(sel), w_taps)  # (4,4,Cin,4,Cout)
    w_big = jnp.pad(w_big, ((0, 0), (0, 0), (0, 0), (0, 0), (0, cpad - Cout)))
    w_all = w_big.reshape(4, 4 * Cin, 4 * cpad).astype(matmul_dtype)

    def pad_vec(v):
        return jnp.pad(v.astype(jnp.float32), (0, cpad - Cout)).reshape(1, cpad)

    b_p, g_p, beta_p = pad_vec(bias), pad_vec(gamma), pad_vec(beta)

    conv_flops = 2 * G * M * (16 * Cin) * (4 * cpad)
    in_bytes = sum(q.size * q.dtype.itemsize for q in quads) + w_all.size * 2

    # ---- pass 1: global per-channel BN batch statistics ----
    num_par = 2 if (G % 2 == 0 and G >= 2) else 1   # use both TCs on v7x
    Gc = G // num_par

    q_spec1 = pl.BlockSpec((1, M, 4 * Cin), lambda c, i: (c * Gc + i, 0, 0))
    w_spec1 = pl.BlockSpec((4, 4 * Cin, 4 * cpad), lambda c, i: (0, 0, 0))
    stats_spec = pl.BlockSpec((1, 8, cpad), lambda c, i: (c, 0, 0))

    stats = pl.pallas_call(
        functools.partial(_stats_kernel, cpad=cpad),
        grid=(num_par, Gc),
        in_specs=[q_spec1, q_spec1, q_spec1, q_spec1, w_spec1],
        out_specs=stats_spec,
        out_shape=jax.ShapeDtypeStruct((num_par, 8, cpad), jnp.float32),
        compiler_params=pltpu.CompilerParams(
            dimension_semantics=("parallel", "arbitrary"),
            vmem_limit_bytes=vmem_limit),
        cost_estimate=pl.CostEstimate(flops=conv_flops, transcendentals=0,
                                      bytes_accessed=in_bytes + num_par * 8 * cpad * 4),
    )(*quads, w_all)

    # ---- fold BN into per-channel scale/shift (tiny, plain XLA) ----
    count = float(N * H * W)
    csum = jnp.sum(stats[:, 0, :], axis=0).reshape(1, cpad)
    cssq = jnp.sum(stats[:, 1, :], axis=0).reshape(1, cpad)
    mean = csum / count + b_p                        # conv bias folded in here
    var = jnp.maximum(cssq / count - (csum / count) ** 2, 0.0)   # biased, clamped
    inv = jax.lax.rsqrt(var + EPS)
    scale = g_p * inv
    shift = (b_p - mean) * scale + beta_p            # applied to the bias-less conv
    scale4 = jnp.tile(scale, (1, 4))                 # per-parity chunk layout
    shift4 = jnp.tile(shift, (1, 4))

    # ---- pass 2: conv -> BN -> ReLU -> 2x2 max-pool, lane-dense bf16 store ----
    q_spec2 = pl.BlockSpec((1, M, 4 * Cin), lambda i: (i, 0, 0))
    w_spec2 = pl.BlockSpec((4, 4 * Cin, 4 * cpad), lambda i: (0, 0, 0))
    v_spec2 = pl.BlockSpec((1, 4 * cpad), lambda i: (0, 0))

    pooled = pl.pallas_call(
        functools.partial(_norm_pool_kernel, cpad=cpad),
        grid=(G,),
        in_specs=[q_spec2, q_spec2, q_spec2, q_spec2, w_spec2, v_spec2, v_spec2],
        out_specs=pl.BlockSpec((1, M, cpad), lambda i: (i, 0, 0)),
        out_shape=jax.ShapeDtypeStruct((G, M, cpad), out_dtype),
        compiler_params=pltpu.CompilerParams(
            dimension_semantics=("parallel",),
            vmem_limit_bytes=vmem_limit),
        cost_estimate=pl.CostEstimate(flops=conv_flops, transcendentals=0,
                                      bytes_accessed=in_bytes + G * M * cpad * out_bytes),
    )(*quads, w_all, scale4, shift4)

    # layout glue back to NCHW, drop channel padding
    out = pooled.reshape(N, Ho, Wo, cpad)[..., :Cout].astype(jnp.float32)
    return jnp.transpose(out, (0, 3, 1, 2))


# ------------------------- pure-JAX reference ------------------------------ #

def ref_forward(x, w, b, gamma, beta):
    conv = jax.lax.conv_general_dilated(
        x, w, window_strides=(1, 1), padding=((1, 1), (1, 1)),
        dimension_numbers=("NCHW", "OIHW", "NCHW"))
    conv = conv + b[None, :, None, None]
    mean = conv.mean(axis=(0, 2, 3), keepdims=True)
    var = conv.var(axis=(0, 2, 3), keepdims=True)       # biased, as in BN training
    y = gamma[None, :, None, None] * (conv - mean) / jnp.sqrt(var + EPS) \
        + beta[None, :, None, None]
    y = jnp.maximum(y, 0.0)
    return jax.lax.reduce_window(y, -jnp.inf, jax.lax.max,
                                 (1, 1, 2, 2), (1, 1, 2, 2), "VALID")


# --------------------------------- main ------------------------------------ #

if __name__ == "__main__":
    N, Cin, Cout, H, W = 2, 4, 8, 16, 16
    key = jax.random.PRNGKey(0)
    k1, k2, k3, k4, k5 = jax.random.split(key, 5)

    x = jax.random.normal(k1, (N, Cin, H, W), jnp.float32)
    w = jax.random.normal(k2, (Cout, Cin, 3, 3), jnp.float32) * 0.1
    bias = jax.random.normal(k3, (Cout,), jnp.float32) * 0.1
    gamma = 1.0 + 0.1 * jax.random.normal(k4, (Cout,), jnp.float32)
    beta = 0.1 * jax.random.normal(k5, (Cout,), jnp.float32)

    # block_h=8 -> 2 row-tiles per image: exercises the grid, the resident
    # stats accumulator and the 2-way parallel stats axis.
    out = encoder_block(x, w, bias, gamma, beta, block_h=8)
    out = jax.block_until_ready(out)
    assert out.shape == (N, Cout, H // 2, W // 2), out.shape

    # Reference on the same bf16-rounded conv operands (kernel uses bf16 MXU
    # operands with f32 accumulation and a bf16 output store).
    xq = x.astype(jnp.bfloat16).astype(jnp.float32)
    wq = w.astype(jnp.bfloat16).astype(jnp.float32)
    err_q = float(jnp.max(jnp.abs(out - ref_forward(xq, wq, bias, gamma, beta))))
    assert err_q < 3e-2, f"max abs diff vs bf16-operand reference: {err_q}"

    # Sanity vs. the full-f32 reference (bf16 operand/output rounding is the gap).
    err_f = float(jnp.max(jnp.abs(out - ref_forward(x, w, bias, gamma, beta))))
    assert err_f < 1e-1, f"max abs diff vs f32 reference: {err_f}"

    print("KERNEL_OK")
</pallas_src>

<mosaic_0001>
module attributes {stable_mosaic.version = 11 : i64} {
  func.func @_stats_kernel(%arg0: i32, %arg1: i32, %arg2: memref<1x32x16xbf16, #tpu.memory_space<vmem>>, %arg3: memref<1x32x16xbf16, #tpu.memory_space<vmem>>, %arg4: memref<1x32x16xbf16, #tpu.memory_space<vmem>>, %arg5: memref<1x32x16xbf16, #tpu.memory_space<vmem>>, %arg6: memref<4x16x512xbf16, #tpu.memory_space<vmem>>, %arg7: memref<1x8x128xf32, #tpu.memory_space<vmem>>) attributes {dimension_semantics = [#tpu.dimension_semantics<parallel>, #tpu.dimension_semantics<arbitrary>], iteration_bounds = array<i64: 2, 2>, scalar_prefetch = 0 : i64, scratch_operands = 0 : i64, tpu.core_type = #tpu.core_type<tc>, window_params = [{transform_indices = @transform_0, window_bounds = array<i64: 1, 32, 16>}, {transform_indices = @transform_1, window_bounds = array<i64: 1, 32, 16>}, {transform_indices = @transform_2, window_bounds = array<i64: 1, 32, 16>}, {transform_indices = @transform_3, window_bounds = array<i64: 1, 32, 16>}, {pipeline_mode = #tpu.pipeline_mode<synchronous>, transform_indices = @transform_4, window_bounds = array<i64: 4, 16, 512>}, {transform_indices = @transform_5, window_bounds = array<i64: 1, 8, 128>}]} {
    %c0_i32 = arith.constant 0 : i32
    %0 = arith.cmpi eq, %arg1, %c0_i32 : i32
    %1 = arith.extui %0 : i1 to i32
    %c0_i32_0 = arith.constant 0 : i32
    %2 = arith.cmpi ne, %1, %c0_i32_0 : i32
    scf.if %2 {
      %cst_35 = arith.constant 0.000000e+00 : f32
      %65 = vector.broadcast %cst_35 : f32 to vector<1x8x128xf32>
      %c0_36 = arith.constant 0 : index
      %c0_37 = arith.constant 0 : index
      %c0_38 = arith.constant 0 : index
      %66 = vector.load %arg7[%c0_36, %c0_37, %c0_38] : memref<1x8x128xf32, #tpu.memory_space<vmem>>, vector<1x8x128xf32>
      tpu.vector_store %arg7[%c0_36, %c0_37, %c0_38], %65 {strides = array<i32>} : memref<1x8x128xf32, #tpu.memory_space<vmem>>, vector<1x8x128xf32>,
    } else {
    }
    %c0 = arith.constant 0 : index
    %c0_1 = arith.constant 0 : index
    %c0_2 = arith.constant 0 : index
    %3 = vector.load %arg2[%c0, %c0_1, %c0_2] : memref<1x32x16xbf16, #tpu.memory_space<vmem>>, vector<1x32x16xbf16>
    %4 = vector.shape_cast %3 : vector<1x32x16xbf16> to vector<32x16xbf16>
    %c0_3 = arith.constant 0 : index
    %c0_4 = arith.constant 0 : index
    %c0_5 = arith.constant 0 : index
    %5 = vector.load %arg6[%c0_3, %c0_4, %c0_5] : memref<4x16x512xbf16, #tpu.memory_space<vmem>>, vector<1x16x512xbf16>
    %6 = vector.shape_cast %5 : vector<1x16x512xbf16> to vector<16x512xbf16>
    %cst = arith.constant dense<0.000000e+00> : vector<32x512xf32>
    %7 = tpu.matmul %4, %6, %cst {dimension_numbers = #tpu.dot_dimension_numbers<[1], [0], [0], [1], [0, 0, 1, 1], [], []>} : vector<32x16xbf16>, vector<16x512xbf16>, vector<32x512xf32> -> vector<32x512xf32>
    %c0_6 = arith.constant 0 : index
    %c0_7 = arith.constant 0 : index
    %c0_8 = arith.constant 0 : index
    %8 = vector.load %arg3[%c0_6, %c0_7, %c0_8] : memref<1x32x16xbf16, #tpu.memory_space<vmem>>, vector<1x32x16xbf16>
    %9 = vector.shape_cast %8 : vector<1x32x16xbf16> to vector<32x16xbf16>
    %c1 = arith.constant 1 : index
    %c0_9 = arith.constant 0 : index
    %c0_10 = arith.constant 0 : index
    %10 = vector.load %arg6[%c1, %c0_9, %c0_10] : memref<4x16x512xbf16, #tpu.memory_space<vmem>>, vector<1x16x512xbf16>
    %11 = vector.shape_cast %10 : vector<1x16x512xbf16> to vector<16x512xbf16>
    %cst_11 = arith.constant dense<0.000000e+00> : vector<32x512xf32>
    %12 = tpu.matmul %9, %11, %cst_11 {dimension_numbers = #tpu.dot_dimension_numbers<[1], [0], [0], [1], [0, 0, 1, 1], [], []>} : vector<32x16xbf16>, vector<16x512xbf16>, vector<32x512xf32> -> vector<32x512xf32>
    %13 = arith.addf %7, %12 : vector<32x512xf32>
    %c0_12 = arith.constant 0 : index
    %c0_13 = arith.constant 0 : index
    %c0_14 = arith.constant 0 : index
    %14 = vector.load %arg4[%c0_12, %c0_13, %c0_14] : memref<1x32x16xbf16, #tpu.memory_space<vmem>>, vector<1x32x16xbf16>
    %15 = vector.shape_cast %14 : vector<1x32x16xbf16> to vector<32x16xbf16>
    %c2 = arith.constant 2 : index
    %c0_15 = arith.constant 0 : index
    %c0_16 = arith.constant 0 : index
    %16 = vector.load %arg6[%c2, %c0_15, %c0_16] : memref<4x16x512xbf16, #tpu.memory_space<vmem>>, vector<1x16x512xbf16>
    %17 = vector.shape_cast %16 : vector<1x16x512xbf16> to vector<16x512xbf16>
    %cst_17 = arith.constant dense<0.000000e+00> : vector<32x512xf32>
    %18 = tpu.matmul %15, %17, %cst_17 {dimension_numbers = #tpu.dot_dimension_numbers<[1], [0], [0], [1], [0, 0, 1, 1], [], []>} : vector<32x16xbf16>, vector<16x512xbf16>, vector<32x512xf32> -> vector<32x512xf32>
    %19 = arith.addf %13, %18 : vector<32x512xf32>
    %c0_18 = arith.constant 0 : index
    %c0_19 = arith.constant 0 : index
    %c0_20 = arith.constant 0 : index
    %20 = vector.load %arg5[%c0_18, %c0_19, %c0_20] : memref<1x32x16xbf16, #tpu.memory_space<vmem>>, vector<1x32x16xbf16>
    %21 = vector.shape_cast %20 : vector<1x32x16xbf16> to vector<32x16xbf16>
    %c3 = arith.constant 3 : index
    %c0_21 = arith.constant 0 : index
    %c0_22 = arith.constant 0 : index
    %22 = vector.load %arg6[%c3, %c0_21, %c0_22] : memref<4x16x512xbf16, #tpu.memory_space<vmem>>, vector<1x16x512xbf16>
    %23 = vector.shape_cast %22 : vector<1x16x512xbf16> to vector<16x512xbf16>
    %cst_23 = arith.constant dense<0.000000e+00> : vector<32x512xf32>
    %24 = tpu.matmul %21, %23, %cst_23 {dimension_numbers = #tpu.dot_dimension_numbers<[1], [0], [0], [1], [0, 0, 1, 1], [], []>} : vector<32x16xbf16>, vector<16x512xbf16>, vector<32x512xf32> -> vector<32x512xf32>
    %25 = arith.addf %19, %24 : vector<32x512xf32>
    %cst_24 = arith.constant dense<0.000000e+00> : vector<512xf32>
    %26 = vector.multi_reduction <add>, %25, %cst_24 [0] : vector<32x512xf32> to vector<512xf32>
    %27 = vector.shape_cast %26 : vector<512xf32> to vector<1x512xf32>
    %28 = arith.mulf %25, %25 : vector<32x512xf32>
    %cst_25 = arith.constant dense<0.000000e+00> : vector<512xf32>
    %29 = vector.multi_reduction <add>, %28, %cst_25 [0] : vector<32x512xf32> to vector<512xf32>
    %30 = vector.shape_cast %29 : vector<512xf32> to vector<1x512xf32>
    %31 = vector.extract_strided_slice %27 {offsets = [0, 0], sizes = [1, 128], strides = [1, 1]} : vector<1x512xf32> to vector<1x128xf32>
    %32 = vector.extract_strided_slice %27 {offsets = [0, 128], sizes = [1, 128], strides = [1, 1]} : vector<1x512xf32> to vector<1x128xf32>
    %33 = arith.addf %31, %32 : vector<1x128xf32>
    %34 = vector.extract_strided_slice %27 {offsets = [0, 256], sizes = [1, 128], strides = [1, 1]} : vector<1x512xf32> to vector<1x128xf32>
    %35 = arith.addf %33, %34 : vector<1x128xf32>
    %36 = vector.extract_strided_slice %27 {offsets = [0, 384], sizes = [1, 128], strides = [1, 1]} : vector<1x512xf32> to vector<1x128xf32>
    %37 = arith.addf %35, %36 : vector<1x128xf32>
    %38 = vector.extract_strided_slice %30 {offsets = [0, 0], sizes = [1, 128], strides = [1, 1]} : vector<1x512xf32> to vector<1x128xf32>
    %39 = vector.extract_strided_slice %30 {offsets = [0, 128], sizes = [1, 128], strides = [1, 1]} : vector<1x512xf32> to vector<1x128xf32>
    %40 = arith.addf %38, %39 : vector<1x128xf32>
    %41 = vector.extract_strided_slice %30 {offsets = [0, 256], sizes = [1, 128], strides = [1, 1]} : vector<1x512xf32> to vector<1x128xf32>
    %42 = arith.addf %40, %41 : vector<1x128xf32>
    %43 = vector.extract_strided_slice %30 {offsets = [0, 384], sizes = [1, 128], strides = [1, 1]} : vector<1x512xf32> to vector<1x128xf32>
    %44 = arith.addf %42, %43 : vector<1x128xf32>
    %45 = tpu.iota {dimensions = array<i32: 0>} : vector<8x128xi32>
    %c0_i32_26 = arith.constant 0 : i32
    %46 = vector.broadcast %c0_i32_26 : i32 to vector<8x128xi32>
    %47 = arith.cmpi eq, %45, %46 : vector<8x128xi32>
    %cst_27 = arith.constant 0.000000e+00 : f32
    %48 = vector.shape_cast %37 : vector<1x128xf32> to vector<1x128xf32>
    %49 = vector.broadcast %48 : vector<1x128xf32> to vector<8x128xf32>
    %50 = vector.broadcast %cst_27 : f32 to vector<8x128xf32>
    %51 = arith.select %47, %49, %50 : vector<8x128xi1>, vector<8x128xf32>
    %c1_i32 = arith.constant 1 : i32
    %52 = vector.broadcast %c1_i32 : i32 to vector<8x128xi32>
    %53 = arith.cmpi eq, %45, %52 : vector<8x128xi32>
    %cst_28 = arith.constant 0.000000e+00 : f32
    %54 = vector.shape_cast %44 : vector<1x128xf32> to vector<1x128xf32>
    %55 = vector.broadcast %54 : vector<1x128xf32> to vector<8x128xf32>
    %56 = vector.broadcast %cst_28 : f32 to vector<8x128xf32>
    %57 = arith.select %53, %55, %56 : vector<8x128xi1>, vector<8x128xf32>
    %58 = arith.addf %51, %57 : vector<8x128xf32>
    %c0_29 = arith.constant 0 : index
    %c0_30 = arith.constant 0 : index
    %c0_31 = arith.constant 0 : index
    %59 = vector.load %arg7[%c0_29, %c0_30, %c0_31] : memref<1x8x128xf32, #tpu.memory_space<vmem>>, vector<1x8x128xf32>
    %60 = vector.shape_cast %59 : vector<1x8x128xf32> to vector<8x128xf32>
    %61 = arith.addf %60, %58 : vector<8x128xf32>
    %c0_32 = arith.constant 0 : index
    %c0_33 = arith.constant 0 : index
    %c0_34 = arith.constant 0 : index
    %62 = vector.load %arg7[%c0_32, %c0_33, %c0_34] : memref<1x8x128xf32, #tpu.memory_space<vmem>>, vector<1x8x128xf32>
    %63 = vector.shape_cast %62 : vector<1x8x128xf32> to vector<8x128xf32>
    %64 = vector.shape_cast %61 : vector<8x128xf32> to vector<1x8x128xf32>
    tpu.vector_store %arg7[%c0_32, %c0_33, %c0_34], %64 {strides = array<i32>} : memref<1x8x128xf32, #tpu.memory_space<vmem>>, vector<1x8x128xf32>,
    return
  }
  func.func @transform_0(%arg0: i32, %arg1: i32) -> (i32, i32, i32) {
    %c2_i32 = arith.constant 2 : i32
    %0 = arith.muli %arg0, %c2_i32 : i32
    %1 = arith.addi %0, %arg1 : i32
    %c0_i32 = arith.constant 0 : i32
    %c0_i32_0 = arith.constant 0 : i32
    %c0_i32_1 = arith.constant 0 : i32
    return %1, %c0_i32, %c0_i32_0 : i32, i32, i32
  }
  func.func @transform_1(%arg0: i32, %arg1: i32) -> (i32, i32, i32) {
    %c2_i32 = arith.constant 2 : i32
    %0 = arith.muli %arg0, %c2_i32 : i32
    %1 = arith.addi %0, %arg1 : i32
    %c0_i32 = arith.constant 0 : i32
    %c0_i32_0 = arith.constant 0 : i32
    %c0_i32_1 = arith.constant 0 : i32
    return %1, %c0_i32, %c0_i32_0 : i32, i32, i32
  }
  func.func @transform_2(%arg0: i32, %arg1: i32) -> (i32, i32, i32) {
    %c2_i32 = arith.constant 2 : i32
    %0 = arith.muli %arg0, %c2_i32 : i32
    %1 = arith.addi %0, %arg1 : i32
    %c0_i32 = arith.constant 0 : i32
    %c0_i32_0 = arith.constant 0 : i32
    %c0_i32_1 = arith.constant 0 : i32
    return %1, %c0_i32, %c0_i32_0 : i32, i32, i32
  }
  func.func @transform_3(%arg0: i32, %arg1: i32) -> (i32, i32, i32) {
    %c2_i32 = arith.constant 2 : i32
    %0 = arith.muli %arg0, %c2_i32 : i32
    %1 = arith.addi %0, %arg1 : i32
    %c0_i32 = arith.constant 0 : i32
    %c0_i32_0 = arith.constant 0 : i32
    %c0_i32_1 = arith.constant 0 : i32
    return %1, %c0_i32, %c0_i32_0 : i32, i32, i32
  }
  func.func @transform_4(%arg0: i32, %arg1: i32) -> (i32, i32, i32) {
    %c0_i32 = arith.constant 0 : i32
    %c0_i32_0 = arith.constant 0 : i32
    %c0_i32_1 = arith.constant 0 : i32
    %c0_i32_2 = arith.constant 0 : i32
    return %c0_i32, %c0_i32_0, %c0_i32_1 : i32, i32, i32
  }
  func.func @transform_5(%arg0: i32, %arg1: i32) -> (i32, i32, i32) {
    %c0_i32 = arith.constant 0 : i32
    %c0_i32_0 = arith.constant 0 : i32
    %c0_i32_1 = arith.constant 0 : i32
    return %arg0, %c0_i32, %c0_i32_0 : i32, i32, i32
  }
}

</mosaic_0001>

<bundles_post_ra>
// kernel: tpu_custom_call.1
= control target key start
LH: loop header
LB: loop body
LE: loop exit
PB: predicated region body
PF: predicated region fallthrough
CT: control target
= control target key end

     0   :  { %10 = vsyncpa [#allocation3], 0  ;;  %s1814_s0 = inlined_call_operand.vmem [shape: bf16[4,32,16], index: 0, kind: input, shape index: {}]   ;;  %s1815_s1 = inlined_call_operand.vmem [shape: bf16[4,32,16], index: 1, kind: input, shape index: {}]   ;;  %s1816_s2 = inlined_call_operand.vmem [shape: bf16[4,32,16], index: 2, kind: input, shape index: {}]   ;;  %s1817_s3 = inlined_call_operand.vmem [shape: bf16[4,32,16], index: 3, kind: input, shape index: {}]   ;;  %s1818_s4 = inlined_call_operand.vmem [shape: bf16[4,16,512], index: 4, kind: input, shape index: {}]   ;;  %s1819_s5 = inlined_call_operand.hbm [shape: f32[2,8,128], index: 5, kind: output, shape index: {}]  }
   0x1   :  { %12 = vsyncpa [#allocation3 + $0x1], 0  ;;  %s1497_s18 = smov 0   ;;  %s1499_s19 = smov 0  }
   0x2   :  { %s1501_s20 = smov 0   ;;  %s1503_s21 = smov 0  }
   0x3   :  { %s1505_s22 = smov 0   ;;  %s1507_s23 = smov 0  }
   0x4   :  { %s1509_s24 = smov 0   ;;  %s1511_s25 = smov 0  }
   0x5 LB: > { %1823 = sst [smem:[#allocation5_spill]] %s1460_s24  ;;  %s1099_s26 = sadd.s32 4294967295, %s1464_s25   ;;  %s1464_s25 = sphi %s1511_s25, %s18_s25   ;;  %s1460_s24 = sphi %s1509_s24, %s1831_s24   ;;  %s1456_s23 = sphi %s1507_s23, %s1836_s23   ;;  %s1452_s22 = sphi %s1505_s22, %s1829_s22   ;;  %s1448_s21 = sphi %s1503_s21, %s1835_s21   ;;  %s1444_s20 = sphi %s1501_s20, %s1834_s20   ;;  %s1440_s19 = sphi %s1499_s19, %s1833_s19   ;;  %s1436_s18 = sphi %s1497_s18, %s1832_s18  }
   0x6   : > { %s1100_s27 = sadd.s32 4294967294, %s1464_s25   ;;  %s27_s28 = sadd.s32 1, %s1456_s23 }
   0x7   : > { %p28_p0 = scmp.ge.s32.totalorder %s27_s28, 2  ;;  %s30_s29 = sadd.s32 1, %s1460_s24 }
   0x8   : > { %p188_p1 = scmp.ne.s32.totalorder %s1444_s20, %s1440_s19  ;;  %p189_p2 = scmp.eq.s32.totalorder %s1099_s26, 3 }
   0x9   : > { %s1838_s28 = smov (%p28_p0, %s27_s28), 0  ;;  %s1840_s29 = smov (!%p28_p0, %s30_s29), %s1460_s24 }
   0xa   : > { %1824 = sst [smem:[#allocation6_spill]] %s1838_s28  ;;  %p1546_p3 = por %p189_p2, %p188_p1 }
   0xb   : > { %p194_p4 = scmp.ne.s32.totalorder %s1440_s19, %s1436_s18  ;;  %p32_p5 = scmp.ge.s32.totalorder %s1840_s29, 2 }
   0xc   : > { %p195_p6 = scmp.eq.s32.totalorder %s1100_s27, 3  ;;  %p1111_p7 = scmp.ge.s32.totalorder %s1464_s25, 1 }
   0xd   : > { %p264_p8 = scmp.lt.s32.totalorder %s1464_s25, 5  ;;  %s1842_s29 = smov (%p32_p5, %s1840_s29), 0 }
   0xe   : > { %1826 = sst [smem:[#allocation7_spill]] %s1842_s29  ;;  %p1556_p9 = por %p195_p6, %p194_p4 }
   0xf   : > { %p265_p10 = pnand %p1111_p7, %p264_p8  ;;  %s175_s7 = ssub.s32 %s1460_s24, %s1842_s29 }
  0x10   : > { %s178_s8 = sadd.s32 1, %s1444_s20  ;;  %p176_p11 = scmp.eq.s32.totalorder %s175_s7, 0 }
  0x11   : > { %268 = sbr.rel (%p265_p10) target bundleno = 318 (0x13e), region = 40  ;;  %s1821_s10 = sand.u32 (!%p265_p10), 1, %s1440_s19  }
  0x12   : > { %s1564_s9 = scalar_select %p176_p11, %s1444_s20, %s178_s8  }
  0x13   : > { %s1113_s11 = sshll.u32 (!%p265_p10), %s1452_s22, 1  ;;  %s1112_s12 = sshll.u32 (!%p265_p10), %s1821_s10, 3 }
  0x14   : > { %s316_s13 = sadd.s32 (!%p265_p10), %s1448_s21, %s1113_s11  ;;  %p1125_p13 = scmp.ne.s32.totalorder (!%p265_p10), %s1448_s21, 0 }
  0x15   : > { %p317_p12 = scmp.lt.s32.totalorder (!%p265_p10), %s316_s13, 3 }
  0x16   : > { %355 = sbr.rel (%p1125_p13) target bundleno = 29 (0x1d), region = 44 }
  0x17   : > { %s1844_s13 = smov (!%p317_p12, %s316_s13), 3 }
  0x18   : > { %s1270_s14 = sshll.u32 %s1844_s13, 4  ;;  %s1591_s13 = scalar_lea.vmem [#allocation2], %s1112_s12 }
  0x19   : > { %s1574_s17 = scalar_lea.vmem %s1814_s0, %s1270_s14  ;;  %s1579_s7 = scalar_lea.vmem %s1815_s1, %s1270_s14 }
  0x1a   : > { %s1584_s28 = scalar_lea.vmem %s1816_s2, %s1270_s14  ;;  %s1589_s24 = scalar_lea.vmem %s1817_s3, %s1270_s14 }
  0x1b   : > { %v1466_v0 = vmov 0.0  }
  0x1c   : > { %356 = vst [vmem:[%s1591_s13] sm:$0xff] %v1466_v0 }
  0x1d PF: > { %v1140_v1 = vld [vmem:[%s1818_s4 + $0x20] sm:$0xf]  ;;  %v1284_v2 = vld [vmem:[%s1818_s4 + $0x2c] sm:$0xf0]  ;;  %v1282_v3 = vld [vmem:[%s1818_s4 + $0x24] sm:$0xf] }
  0x1e   : > { %v1141_v4 = vor.u32 %v1284_v2, %v1140_v1  ;;  %v1142_v5 = vld [vmem:[%s1818_s4 + $0x30] sm:$0xf0]  ;;  %v1148_v6 = vld [vmem:[%s1818_s4 + $0x28] sm:$0xf]  ;;  %v1285_v7 = vld [vmem:[%s1818_s4 + $0x34] sm:$0xf0] }
  0x1f   : > { %v1145_v8 = vor.u32 %v1282_v3, %v1142_v5  ;;  %v1149_v9 = vor.u32 %v1285_v7, %v1148_v6  ;;  %v1283_v10 = vld [vmem:[%s1818_s4 + $0x2c] sm:$0xf]  ;;  %v1150_v11 = vld [vmem:[%s1818_s4 + $0x38] sm:$0xf0]  ;;  %v1280_v12 = vld [vmem:[%s1579_s7] sm:$0xff]  ;;  %vm404_vm0 = vcmask 130048  }
  0x20   : > { %418 = vmatpush.bf16.msra.mxu0 %v1141_v4  ;;  %v1153_v13 = vor.u32 %v1283_v10, %v1150_v11  ;;  %v1180_v14 = vld [vmem:[%s1818_s4 + $0x8] sm:$0xf]  ;;  %v1279_v15 = vld [vmem:[%s1818_s4 + $0x14] sm:$0xf0]  ;;  %v1277_v16 = vld [vmem:[%s1818_s4 + $0xc] sm:$0xf] }
  0x21   : > { %437 = vmatpush.bf16.msra.mxu1 %v1145_v8  ;;  %456 = vmatpush.bf16.msra.mxu2 %v1149_v9  ;;  %v1181_v17 = vor.u32 %v1279_v15, %v1180_v14  ;;  %v1182_v18 = vld [vmem:[%s1818_s4 + $0x18] sm:$0xf0]  ;;  %v1172_v19 = vld [vmem:[%s1818_s4] sm:$0xf]  ;;  %v1278_v20 = vld [vmem:[%s1818_s4 + $0xc] sm:$0xf0] }
  0x22   : > { %475 = vmatpush.bf16.msra.mxu3 %v1153_v13  ;;  %v1185_v21 = vor.u32 %v1277_v16, %v1182_v18  ;;  %v1173_v22 = vor.u32 %v1278_v20, %v1172_v19  ;;  %v1276_v23 = vld [vmem:[%s1818_s4 + $0x4] sm:$0xf]  ;;  %v1174_v24 = vld [vmem:[%s1818_s4 + $0x10] sm:$0xf0]  ;;  %v1216_v26 = vld [vmem:[%s1818_s4 + $0x48] sm:$0xf] }
  0x23   : > { %1154 = vmatmul.msk.bf16.vlgmr.msra.gmra.mxu0 %vm404_vm0, %v1280_v12  ;;  %v1177_v25 = vor.u32 %v1276_v23, %v1174_v24  ;;  %v1291_v27 = vld [vmem:[%s1818_s4 + $0x54] sm:$0xf0]  ;;  %v1289_v28 = vld [vmem:[%s1818_s4 + $0x4c] sm:$0xf]  ;;  %v1218_v30 = vld [vmem:[%s1818_s4 + $0x58] sm:$0xf0] }
  0x24   : > { %1156 = vmatmul.msk.bf16.vlgmr.msra.gmra.mxu1 %vm404_vm0, %v1280_v12  ;;  %1158 = vmatmul.msk.bf16.vlgmr.msra.gmra.mxu2 %vm404_vm0, %v1280_v12  ;;  %v1217_v29 = vor.u32 %v1291_v27, %v1216_v26  ;;  %v1208_v31 = vld [vmem:[%s1818_s4 + $0x40] sm:$0xf]  ;;  %v1290_v32 = vld [vmem:[%s1818_s4 + $0x4c] sm:$0xf0]  ;;  %v1221_v33 = vor.u32 %v1289_v28, %v1218_v30  ;;  %v1288_v35 = vld [vmem:[%s1818_s4 + $0x44] sm:$0xf] }
  0x25   : > { %568 = vmatpush.bf16.msrb.mxu2 %v1181_v17  ;;  %1160 = vmatmul.msk.bf16.vlgmr.msra.gmra.mxu3 %vm404_vm0, %v1280_v12  ;;  %v1209_v34 = vor.u32 %v1290_v32, %v1208_v31  ;;  %v1210_v36 = vld [vmem:[%s1818_s4 + $0x50] sm:$0xf0]  ;;  %v1281_v38 = vld [vmem:[%s1579_s7 + $0x8] sm:$0xff]  ;;  %v1274_v39 = vld [vmem:[%s1574_s17] sm:$0xff]  ;;  %s990_s27 = sshll.u32 %s1591_s13, 4  ;;  %s1390_s10 = scalar_lea.hbm %s1819_s5, 16  ;;  %s991_s27 = int_to_ptr.vmem [resolvable:$true] %s990_s27 }
  0x26   : > { %530 = vmatpush.bf16.msrb.mxu0 %v1173_v22  ;;  %587 = vmatpush.bf16.msrb.mxu3 %v1185_v21  ;;  %v1213_v37 = vor.u32 %v1288_v35, %v1210_v36  ;;  %v1252_v40 = vld [vmem:[%s1818_s4 + $0x68] sm:$0xf]  ;;  %v1297_v41 = vld [vmem:[%s1818_s4 + $0x74] sm:$0xf0]  ;;  %v1295_v42 = vld [vmem:[%s1818_s4 + $0x6c] sm:$0xf] }
  0x27   : > { %549 = vmatpush.bf16.msrb.mxu1 %v1177_v25  ;;  %v1253_v43 = vor.u32 %v1297_v41, %v1252_v40  ;;  %v1254_v44 = vld [vmem:[%s1818_s4 + $0x78] sm:$0xf0]  ;;  %v1244_v45 = vld [vmem:[%s1818_s4 + $0x60] sm:$0xf]  ;;  %v1296_v46 = vld [vmem:[%s1818_s4 + $0x6c] sm:$0xf0] }
  0x28   : > { %v1257_v47 = vor.u32 %v1295_v42, %v1254_v44  ;;  %v1245_v48 = vor.u32 %v1296_v46, %v1244_v45  ;;  %v1294_v49 = vld [vmem:[%s1818_s4 + $0x64] sm:$0xf]  ;;  %v1246_v50 = vld [vmem:[%s1818_s4 + $0x70] sm:$0xf0]  ;;  %v1275_v52 = vld [vmem:[%s1574_s17 + $0x8] sm:$0xff] }
  0x29   : > { %689 = vmatpush.bf16.msra.mxu2 %v1217_v29  ;;  %v1249_v51 = vor.u32 %v1294_v49, %v1246_v50  ;;  %v1286_v53 = vld [vmem:[%s1584_s28] sm:$0xff]  ;;  %v1287_v54 = vld [vmem:[%s1584_s28 + $0x8] sm:$0xff] }
  0x2a   : > { %708 = vmatpush.bf16.msra.mxu3 %v1221_v33  ;;  %651 = vmatpush.bf16.msra.mxu0 %v1209_v34  ;;  %v1292_v55 = vld [vmem:[%s1589_s24] sm:$0xff]  ;;  %v1293_v56 = vld [vmem:[%s1589_s24 + $0x8] sm:$0xff]  ;;  %s1267_s24 = sshll.u32 %s1452_s22, 3  ;;  %s1828_s22 = sand.u32 1, %s1440_s19  }
  0x2b   : > { %670 = vmatpush.bf16.msra.mxu1 %v1213_v37  ;;  %s988_s12 = scalar_lea.hbm %s1819_s5, %s1267_s24  ;;  %s978_s11 = scalar_lea.sflag [#allocation3], %s1828_s22 }
  0x2c   : > { %s992_s8 = sshll.u32 %s988_s12, 4  ;;  %s993_s8 = int_to_ptr.hbm [resolvable:$true] %s992_s8 }
  0x2d   : > { %s1384_s15 = sshra.s32 %s993_s8, 4  ;;  %s1385_s15 = int_to_ptr.hbm [resolvable:$true] %s1384_s15 }
  0x2e   : > { %s1386_s16 = scalar_lea.hbm %s1385_s15, 8  ;;  %p1391_p4 = scmp.lt.s32.totalorder %s1385_s15, %s1819_s5 }
  0x2f   : > { %p1387_p0 = scmp.ne.s32.totalorder %s1385_s15, %s1386_s16  ;;  %p1392_p5 = scmp.lt.s32.totalorder %s1390_s10, %s1386_s16 }
  0x31   : > { %p1388_p1 = pnand %p1387_p0, %p1546_p3  ;;  %p1393_p6 = por %p1392_p5, %p1391_p4 }
  0x33   : > { %1155 = vmatmul.msk.bf16.gmra.mxu0 %vm404_vm0, %v1281_v38  ;;  %p1389_p2 = pneg %p1388_p1 }
  0x34   : > { %1157 = vmatmul.msk.bf16.gmra.mxu1 %vm404_vm0, %v1281_v38  ;;  %1159 = vmatmul.msk.bf16.gmra.mxu2 %vm404_vm0, %v1281_v38 }
  0x35   : > { %1161 = vmatmul.msk.bf16.gmra.mxu3 %vm404_vm0, %v1281_v38  ;;  %p1394_p7 = pnand %p1393_p6, %p1389_p2 }
  0x43   : > { %1186 = vmatmul.msk.bf16.vlgmr.msrb.gmra.mxu0 %vm404_vm0, %v1274_v39 }
  0x44   : > { %1188 = vmatmul.msk.bf16.vlgmr.msrb.gmra.mxu1 %vm404_vm0, %v1274_v39  ;;  %1190 = vmatmul.msk.bf16.vlgmr.msrb.gmra.mxu2 %vm404_vm0, %v1274_v39 }
  0x45   : > { %1192 = vmatmul.msk.bf16.vlgmr.msrb.gmra.mxu3 %vm404_vm0, %v1274_v39  ;;  %826 = vmatpush.bf16.msrb.mxu2 %v1253_v43 }
  0x46   : > { %845 = vmatpush.bf16.msrb.mxu3 %v1257_v47  ;;  %788 = vmatpush.bf16.msrb.mxu0 %v1245_v48 }
  0x47   : > { %807 = vmatpush.bf16.msrb.mxu1 %v1249_v51 }
  0x53   : > { %1187 = vmatmul.msk.bf16.gmra.mxu0 %vm404_vm0, %v1275_v52 }
  0x54   : > { %1189 = vmatmul.msk.bf16.gmra.mxu1 %vm404_vm0, %v1275_v52  ;;  %1191 = vmatmul.msk.bf16.gmra.mxu2 %vm404_vm0, %v1275_v52 }
  0x55   : > { %1193 = vmatmul.msk.bf16.gmra.mxu3 %vm404_vm0, %v1275_v52 }
  0x63   : > { %1222 = vmatmul.msk.bf16.vlgmr.msra.gmra.mxu0 %vm404_vm0, %v1286_v53 }
  0x64   : > { %1224 = vmatmul.msk.bf16.vlgmr.msra.gmra.mxu1 %vm404_vm0, %v1286_v53  ;;  %1226 = vmatmul.msk.bf16.vlgmr.msra.gmra.mxu2 %vm404_vm0, %v1286_v53 }
  0x65   : > { %1228 = vmatmul.msk.bf16.vlgmr.msra.gmra.mxu3 %vm404_vm0, %v1286_v53 }
  0x73   : > { %1223 = vmatmul.msk.bf16.gmra.mxu0 %vm404_vm0, %v1287_v54 }
  0x74   : > { %1225 = vmatmul.msk.bf16.gmra.mxu1 %vm404_vm0, %v1287_v54  ;;  %1227 = vmatmul.msk.bf16.gmra.mxu2 %vm404_vm0, %v1287_v54 }
  0x75   : > { %1229 = vmatmul.msk.bf16.gmra.mxu3 %vm404_vm0, %v1287_v54 }
  0x83   : > { %1258 = vmatmul.msk.bf16.vlgmr.msrb.gmra.mxu0 %vm404_vm0, %v1292_v55 }
  0x84   : > { %1260 = vmatmul.msk.bf16.vlgmr.msrb.gmra.mxu1 %vm404_vm0, %v1292_v55  ;;  %1262 = vmatmul.msk.bf16.vlgmr.msrb.gmra.mxu2 %vm404_vm0, %v1292_v55 }
  0x85   : > { %1264 = vmatmul.msk.bf16.vlgmr.msrb.gmra.mxu3 %vm404_vm0, %v1292_v55 }
  0x93   : > { %1259 = vmatmul.msk.bf16.gmra.mxu0 %vm404_vm0, %v1293_v56 }
  0x94   : > { %1261 = vmatmul.msk.bf16.gmra.mxu1 %vm404_vm0, %v1293_v56  ;;  %1263 = vmatmul.msk.bf16.gmra.mxu2 %vm404_vm0, %v1293_v56 }
  0x95   : > { %1265 = vmatmul.msk.bf16.gmra.mxu3 %vm404_vm0, %v1293_v56 }
  0xa0   : > { %v420_v57 = vpop.f32.mrf.mxu0 }
  0xa1   : > { %v439_v58 = vpop.f32.mrf.mxu1 }
  0xa7   : > { %v458_v59 = vpop.f32.mrf.mxu2 }
  0xa8   : > { %v477_v60 = vpop.f32.mrf.mxu3  ;;  %v422_v61 = vpop.f32.mrf.mxu0 }
  0xa9   : > { %v441_v62 = vpop.f32.mrf.mxu1 }
  0xaf   : > { %v460_v63 = vpop.f32.mrf.mxu2 }
  0xb0   : > { %v479_v0 = vpop.f32.mrf.mxu3  ;;  %v425_v1 = vpop.f32.mrf.mxu0 }
  0xb1   : > { %v444_v2 = vpop.f32.mrf.mxu1 }
  0xb7   : > { %v463_v3 = vpop.f32.mrf.mxu2 }
  0xb8   : > { %v482_v4 = vpop.f32.mrf.mxu3  ;;  %v1731_v5 = vpop.f32.mrf.mxu0 }
  0xb9   : > { %v1733_v6 = vpop.f32.mrf.mxu1 }
  0xbf   : > { %v1735_v7 = vpop.f32.mrf.mxu2 }
  0xc0   : > { %v1737_v8 = vpop.f32.mrf.mxu3  ;;  %v532_v9 = vpop.f32.mrf.mxu0 }
  0xc1   : > { %v533_v10 = vadd.f32 %v532_v9, %v420_v57  ;;  %v551_v11 = vpop.f32.mrf.mxu1 }
  0xc2   : > { %v552_v12 = vadd.f32 %v551_v11, %v439_v58 }
  0xc7   : > { %v570_v13 = vpop.f32.mrf.mxu2 }
  0xc8   : > { %v571_v14 = vadd.f32 %v570_v13, %v458_v59  ;;  %v589_v15 = vpop.f32.mrf.mxu3  ;;  %v534_v16 = vpop.f32.mrf.mxu0 }
  0xc9   : > { %v590_v17 = vadd.f32 %v589_v15, %v477_v60  ;;  %v535_v18 = vadd.f32 %v534_v16, %v422_v61  ;;  %v553_v19 = vpop.f32.mrf.mxu1 }
  0xca   : > { %v554_v20 = vadd.f32 %v553_v19, %v441_v62 }
  0xcf   : > { %v572_v21 = vpop.f32.mrf.mxu2 }
  0xd0   : > { %v573_v22 = vadd.f32 %v572_v21, %v460_v63  ;;  %v591_v23 = vpop.f32.mrf.mxu3  ;;  %v537_v24 = vpop.f32.mrf.mxu0 }
  0xd1   : > { %v592_v25 = vadd.f32 %v591_v23, %v479_v0  ;;  %v538_v26 = vadd.f32 %v537_v24, %v425_v1  ;;  %v556_v27 = vpop.f32.mrf.mxu1 }
  0xd2   : > { %v557_v28 = vadd.f32 %v556_v27, %v444_v2 }
  0xd7   : > { %v575_v29 = vpop.f32.mrf.mxu2 }
  0xd8   : > { %v1739_v30 = vadd.f32 %v575_v29, %v463_v3  ;;  %v594_v31 = vpop.f32.mrf.mxu3  ;;  %v1741_v32 = vpop.f32.mrf.mxu0 }
  0xd9   : > { %v1743_v33 = vadd.f32 %v594_v31, %v482_v4  ;;  %v1745_v34 = vpop.f32.mrf.mxu1 }
  0xdf   : > { %v1747_v35 = vpop.f32.mrf.mxu2 }
  0xe0   : > { %v1749_v36 = vpop.f32.mrf.mxu3  ;;  %v653_v37 = vpop.f32.mrf.mxu0 }
  0xe1   : > { %v672_v38 = vpop.f32.mrf.mxu1  ;;  %v720_v55 = vadd.f32 %v653_v37, %v533_v10 }
  0xe2   : > { %v721_v56 = vadd.f32 %v672_v38, %v552_v12 }
  0xe7   : > { %v691_v39 = vpop.f32.mrf.mxu2 }
  0xe8   : > { %v710_v40 = vpop.f32.mrf.mxu3  ;;  %v655_v41 = vpop.f32.mrf.mxu0  ;;  %v722_v3 = vadd.f32 %v691_v39, %v571_v14 }
  0xe9   : > { %v674_v42 = vpop.f32.mrf.mxu1  ;;  %v724_v57 = vadd.f32 %v655_v41, %v535_v18  ;;  %v723_v13 = vadd.f32 %v710_v40, %v590_v17 }
  0xea   : > { %v725_v60 = vadd.f32 %v674_v42, %v554_v20 }
  0xef   : > { %v693_v43 = vpop.f32.mrf.mxu2 }
  0xf0   : > { %v712_v44 = vpop.f32.mrf.mxu3  ;;  %v658_v45 = vpop.f32.mrf.mxu0  ;;  %v726_v18 = vadd.f32 %v693_v43, %v573_v22 }
  0xf1   : > { %v677_v46 = vpop.f32.mrf.mxu1  ;;  %v727_v20 = vadd.f32 %v712_v44, %v592_v25  ;;  %v728_v24 = vadd.f32 %v658_v45, %v538_v26 }
  0xf2   : > { %v729_v29 = vadd.f32 %v677_v46, %v557_v28  ;;  %v540_v28 = vadd.f32 %v1741_v32, %v1731_v5  ;;  %v559_v46 = vadd.f32 %v1745_v34, %v1733_v6 }
  0xf7   : > { %v696_v47 = vpop.f32.mrf.mxu2 }
  0xf8   : > { %v715_v48 = vpop.f32.mrf.mxu3  ;;  %v660_v49 = vpop.f32.mrf.mxu0 }
  0xf9   : > { %v679_v50 = vpop.f32.mrf.mxu1 }
  0xff   : > { %v1751_v51 = vpop.f32.mrf.mxu2 }
 0x100   : > { %v1753_v52 = vpop.f32.mrf.mxu3  ;;  %v790_v53 = vpop.f32.mrf.mxu0 }
 0x101   : > { %v809_v54 = vpop.f32.mrf.mxu1  ;;  %v857_v58 = vadd.f32 %v790_v53, %v720_v55 }
 0x102   : > { %v858_v61 = vadd.f32 %v809_v54, %v721_v56 }
 0x103   : > { %v909_v4 = vmul.f32 %v857_v58, %v857_v58 }
 0x104   : > { %v910_v15 = vmul.f32 %v858_v61, %v858_v61 }
 0x107   : > { %v828_v59 = vpop.f32.mrf.mxu2 }
 0x108   : > { %v847_v62 = vpop.f32.mrf.mxu3  ;;  %v792_v63 = vpop.f32.mrf.mxu0  ;;  %v859_v10 = vadd.f32 %v828_v59, %v722_v3 }
 0x109   : > { %v861_v0 = vadd.f32 %v792_v63, %v724_v57  ;;  %v811_v1 = vpop.f32.mrf.mxu1  ;;  %v860_v21 = vadd.f32 %v847_v62, %v723_v13  ;;  %v733_v63 = vadd.f32 %v679_v50, %v559_v46 }
 0x10a   : > { %v862_v2 = vadd.f32 %v811_v1, %v725_v60  ;;  %v911_v14 = vmul.f32 %v859_v10, %v859_v10  ;;  %v731_v60 = vadd.f32 %v715_v48, %v1743_v33 }
 0x10b   : > { %v873_v9 = vadd.f32 %v861_v0, %v857_v58  ;;  %v913_v11 = vmul.f32 %v861_v0, %v861_v0  ;;  %v912_v17 = vmul.f32 %v860_v21, %v860_v21  ;;  %v730_v58 = vadd.f32 %v696_v47, %v1739_v30 }
 0x10c   : > { %v882_v16 = vadd.f32 %v862_v2, %v858_v61  ;;  %v914_v19 = vmul.f32 %v862_v2, %v862_v2  ;;  %v732_v61 = vadd.f32 %v660_v49, %v540_v28  ;;  %v578_v30 = vadd.f32 %v1747_v35, %v1735_v7 }
 0x10d   : > { %v925_v12 = vadd.f32 %v913_v11, %v909_v4  ;;  %v597_v49 = vadd.f32 %v1749_v36, %v1737_v8 }
 0x10e   : > { %v934_v23 = vadd.f32 %v914_v19, %v910_v15 }
 0x10f   : > { %v830_v27 = vpop.f32.mrf.mxu2 }
 0x110   : > { %v863_v31 = vadd.f32 %v830_v27, %v726_v18  ;;  %v849_v37 = vpop.f32.mrf.mxu3  ;;  %v795_v38 = vpop.f32.mrf.mxu0 }
 0x111   : > { %v864_v39 = vadd.f32 %v849_v37, %v727_v20  ;;  %v865_v41 = vadd.f32 %v795_v38, %v728_v24  ;;  %v814_v42 = vpop.f32.mrf.mxu1 }
 0x112   : > { %v891_v40 = vadd.f32 %v863_v31, %v859_v10  ;;  %v915_v53 = vmul.f32 %v863_v31, %v863_v31  ;;  %v866_v54 = vadd.f32 %v814_v42, %v729_v29  ;;  %v734_v10 = vadd.f32 %v1751_v51, %v578_v30 }
 0x113   : > { %v900_v55 = vadd.f32 %v864_v39, %v860_v21  ;;  %v916_v56 = vmul.f32 %v864_v39, %v864_v39  ;;  %v874_v22 = vadd.f32 %v873_v9, %v865_v41  ;;  %v917_v43 = vmul.f32 %v865_v41, %v865_v41 }
 0x114   : > { %v943_v57 = vadd.f32 %v915_v53, %v911_v14  ;;  %v883_v25 = vadd.f32 %v882_v16, %v866_v54  ;;  %v918_v26 = vmul.f32 %v866_v54, %v866_v54  ;;  %v735_v21 = vadd.f32 %v1753_v52, %v597_v49 }
 0x115   : > { %v952_v44 = vadd.f32 %v916_v56, %v912_v17  ;;  %v926_v45 = vadd.f32 %v925_v12, %v917_v43 }
 0x116   : > { %v935_v59 = vadd.f32 %v934_v23, %v918_v26 }
 0x117   : > { %v833_v62 = vpop.f32.mrf.mxu2 }
 0x118   : > { %v867_v0 = vadd.f32 %v833_v62, %v730_v58  ;;  %v852_v1 = vpop.f32.mrf.mxu3  ;;  %v797_v2 = vpop.f32.mrf.mxu0 }
 0x119   : > { %v868_v3 = vadd.f32 %v852_v1, %v731_v60  ;;  %v869_v4 = vadd.f32 %v797_v2, %v732_v61  ;;  %v816_v9 = vpop.f32.mrf.mxu1 }
 0x11a   : > { %v892_v5 = vadd.f32 %v891_v40, %v867_v0  ;;  %v919_v32 = vmul.f32 %v867_v0, %v867_v0  ;;  %v870_v11 = vadd.f32 %v816_v9, %v733_v63 }
 0x11b   : > { %v901_v13 = vadd.f32 %v900_v55, %v868_v3  ;;  %v920_v15 = vmul.f32 %v868_v3, %v868_v3  ;;  %v875_v6 = vadd.f32 %v874_v22, %v869_v4  ;;  %v921_v34 = vmul.f32 %v869_v4, %v869_v4 }
 0x11c   : > { %v944_v33 = vadd.f32 %v943_v57, %v919_v32  ;;  %v884_v47 = vadd.f32 %v883_v25, %v870_v11  ;;  %v922_v48 = vmul.f32 %v870_v11, %v870_v11  ;;  %v967_v11 = vlaneseq }
 0x11d   : > { %v953_v50 = vadd.f32 %v952_v44, %v920_v15  ;;  %v876_v16 = vrot.slane %v875_v6, 4  ;;  %v927_v19 = vadd.f32 %v926_v45, %v921_v34 }
 0x11e   : > { %v885_v12 = vrot.slane %v884_v47, 4  ;;  %v936_v18 = vadd.f32 %v935_v59, %v922_v48  ;;  %v968_v49 = vshrl.u32 %v967_v11, 7 }
 0x11f   : > { %v877_v23 = vadd.f32 %v876_v16, %v875_v6  ;;  %v928_v20 = vrot.slane %v927_v19, 4  ;;  %v835_v24 = vpop.f32.mrf.mxu2 }
 0x120   : > { %v886_v27 = vadd.f32 %v885_v12, %v884_v47  ;;  %v937_v7 = vrot.slane %v936_v18, 4  ;;  %v871_v35 = vadd.f32 %v835_v24, %v734_v10  ;;  %v854_v29 = vpop.f32.mrf.mxu3  ;;  %vm969_vm1 = vcmp.eq.s32.totalorder %v968_v49, 0  ;;  %v974_v24 = vld [vmem:[%s1591_s13] sm:$0xff] }
 0x121   : > { %v878_v31 = vrot.slane %v877_v23, 2  ;;  %v929_v37 = vadd.f32 %v928_v20, %v927_v19  ;;  %v872_v38 = vadd.f32 %v854_v29, %v735_v21  ;;  %vm971_vm2 = vcmp.eq.s32.totalorder %v968_v49, 1 }
 0x122   : > { %v887_v8 = vrot.slane %v886_v27, 2  ;;  %v938_v36 = vadd.f32 %v937_v7, %v936_v18  ;;  %v893_v14 = vadd.f32 %v892_v5, %v871_v35  ;;  %v923_v39 = vmul.f32 %v871_v35, %v871_v35 }
 0x123   : > { %v879_v41 = vadd.f32 %v878_v31, %v877_v23  ;;  %v930_v51 = vrot.slane %v929_v37, 2  ;;  %v902_v42 = vadd.f32 %v901_v13, %v872_v38  ;;  %v924_v17 = vmul.f32 %v872_v38, %v872_v38 }
 0x124   : > { %v888_v40 = vadd.f32 %v887_v8, %v886_v27  ;;  %v939_v52 = vrot.slane %v938_v36, 2  ;;  %v894_v53 = vrot.slane %v893_v14, 4  ;;  %v945_v54 = vadd.f32 %v944_v33, %v923_v39 }
 0x125   : > { %v880_v55 = vrot.slane %v879_v41, 1  ;;  %v931_v56 = vadd.f32 %v930_v51, %v929_v37  ;;  %v903_v22 = vrot.slane %v902_v42, 4  ;;  %v954_v43 = vadd.f32 %v953_v50, %v924_v17 }
 0x126   : > { %v889_v57 = vrot.slane %v888_v40, 1  ;;  %v940_v25 = vadd.f32 %v939_v52, %v938_v36  ;;  %v895_v26 = vadd.f32 %v894_v53, %v893_v14  ;;  %v946_v28 = vrot.slane %v945_v54, 4 }
 0x127   : > { %v881_v44 = vadd.f32 %v880_v55, %v879_v41  ;;  %v932_v45 = vrot.slane %v931_v56, 1  ;;  %v904_v46 = vadd.f32 %v903_v22, %v902_v42  ;;  %v955_v58 = vrot.slane %v954_v43, 4 }
 0x128   : > { %v890_v59 = vadd.f32 %v889_v57, %v888_v40  ;;  %v941_v60 = vrot.slane %v940_v25, 1  ;;  %v896_v61 = vrot.slane %v895_v26, 2  ;;  %v947_v62 = vadd.f32 %v946_v28, %v945_v54 }
 0x129   : > { %v933_v63 = vadd.f32 %v932_v45, %v931_v56  ;;  %v905_v0 = vrot.slane %v904_v46, 2  ;;  %v956_v1 = vadd.f32 %v955_v58, %v954_v43 }
 0x12a   : > { %v942_v2 = vadd.f32 %v941_v60, %v940_v25  ;;  %v961_v3 = vadd.f32 %v890_v59, %v881_v44  ;;  %v897_v4 = vadd.f32 %v896_v61, %v895_v26  ;;  %v948_v9 = vrot.slane %v947_v62, 2 }
 0x12b   : > { %v906_v5 = vadd.f32 %v905_v0, %v904_v46  ;;  %v957_v32 = vrot.slane %v956_v1, 2 }
 0x12c   : > { %v964_v13 = vadd.f32 %v942_v2, %v933_v63  ;;  %v898_v15 = vrot.slane %v897_v4, 1  ;;  %v949_v6 = vadd.f32 %v948_v9, %v947_v62 }
 0x12d   : > { %v907_v34 = vrot.slane %v906_v5, 1  ;;  %v958_v30 = vadd.f32 %v957_v32, %v956_v1 }
 0x12e   : > { %v899_v33 = vadd.f32 %v898_v15, %v897_v4  ;;  %v950_v47 = vrot.slane %v949_v6, 1 }
 0x12f   : > { %v959_v48 = vrot.slane %v958_v30, 1  ;;  %v908_v19 = vadd.f32 %v907_v34, %v906_v5 }
 0x130   : > { %v951_v50 = vadd.f32 %v950_v47, %v949_v6  ;;  %v962_v16 = vadd.f32 %v961_v3, %v899_v33 }
 0x131   : > { %v960_v10 = vadd.f32 %v959_v48, %v958_v30 }
 0x132   : > { %v963_v12 = vadd.f32 %v962_v16, %v908_v19  ;;  %v965_v18 = vadd.f32 %v964_v13, %v951_v50 }
 0x134   : > { %v966_v21 = vadd.f32 %v965_v18, %v960_v10  ;;  %v970_v23 = vsel %vm969_vm1, %v963_v12, 0.0 }
 0x136   : > { %v972_v20 = vsel %vm971_vm2, %v966_v21, 0.0 }
 0x137   : > { %v973_v27 = vadd.f32 %v972_v20, %v970_v23 }
 0x139   : > { %v975_v7 = vadd.f32 %v974_v24, %v973_v27 }
 0x13b   : > { %976 = vst [vmem:[%s1591_s13] sm:$0xff] %v975_v7 }
 0x13c   : > { %1397 = shalt.err (!%p1394_p7)
}
 0x13d   : > { %1298 = dma.vmem_to_hbm [thread:$0]  (%p1546_p3), %s991_s27, 128, %s993_s8, %s978_s11  }
 0x13e PF: > { %p1304_p8 = scmp.ge.s32.totalorder %s1464_s25, 2  ;;  %s1004_s13 = sand.u32 1, %s1436_s18  }
 0x13f   : > { %s1005_s21 = scalar_lea.sflag [#allocation3], %s1004_s13 }
 0x140   : > { %p1301_p10 = pnand %p1304_p8, %p1556_p9 }
 0x142   : > { %p1302_p11 = pneg %p1301_p10 }
 0x144   : > { %1431 = dma.done.wait (%p1302_p11), %s1005_s21, 128  }
 0x145   : > { %1433 = vsyncadd (%p1302_p11), %s1005_s21, 4294967168  ;;  %s18_s25 = sadd.s32 1, %s1464_s25   ;;  %s1829_s22 = sld [smem:[#allocation5_spill]] }
 0x146   : > { %p15_p12 = scmp.ge.s32.totalorder %s18_s25, 6   ;;  %s1830_s30 = sld [smem:[#allocation6_spill]] }
 0x147   : > { %s1831_s24 = sld [smem:[#allocation7_spill]]  ;;  %s1832_s18 = smov %s1440_s19 }
 0x148   : > { %s1833_s19 = smov %s1444_s20  ;;  %s1834_s20 = smov %s1564_s9 }
 0x149   : > { %s1835_s21 = smov %s1456_s23  ;;  %17 = sbr.rel (!%p15_p12) target bundleno = 5 (0x5), region = 91 }
 0x14c   : > { %s1836_s23 = smov %s1830_s30 }
 0x14e   :  { %1011 = vsyncpa [#allocation3], 1 }
 0x14f   :  { %1013 = vsyncpa [#allocation3 + $0x1], 1 }

</bundles_post_ra>
